<compile_context>
chip_gen: v5e
topology: v5e:2x2
jax: 0.10.0
libtpu: 0.0.40
codegen_flags: <defaults>
</compile_context>

<pallas_src>
import math
from functools import partial

import jax
import jax.numpy as jnp
from jax import lax
from jax.experimental import pallas as pl
from jax.experimental.pallas import tpu as pltpu


_MASK_VALUE = -1e30                    # large finite negative: robust vs -inf
_V7X_VMEM_CAP = 56 * 1024 * 1024       # never request the full 64 MiB/TC of v7x
_VMEM_HEADROOM = 8 * 1024 * 1024       # compiler-internal scratch headroom


def _vmem_limit(pipelined_block_bytes, scratch_bytes=0):
    """Scoped-VMEM request computed from the actual block sizes (double-buffered)."""
    need = 2 * pipelined_block_bytes + scratch_bytes + _VMEM_HEADROOM
    return int(min(need, _V7X_VMEM_CAP))


# ---------------------------------------------------------------------------
# Kernel 1: fused QKV projection — one (tl, d) x (d, 3d) matmul
# ---------------------------------------------------------------------------
def _qkv_proj_kernel(x_ref, w3_ref, q_ref, k_ref, v_ref):
    d = q_ref.shape[-1]
    x = x_ref[...].astype(w3_ref.dtype)                      # cast to compute dtype
    y = jnp.dot(x, w3_ref[...], preferred_element_type=jnp.float32)   # (tl, 3d) f32
    q_ref[...] = y[:, :d].astype(q_ref.dtype)
    k_ref[...] = y[:, d:2 * d].astype(k_ref.dtype)
    v_ref[...] = y[:, 2 * d:].astype(v_ref.dtype)


# ---------------------------------------------------------------------------
# Kernel 2: causal flash attention + fused output projection
# grid = (B, num_q_tiles, num_kv_tiles); kv is the innermost reduction axis.
# ---------------------------------------------------------------------------
def _flash_attn_kernel(q_ref, k_ref, v_ref, wp_ref, o_ref,
                       acc_sc, m_sc, l_sc, *, h):
    tq, d = q_ref.shape
    tkv = k_ref.shape[0]
    dh = d // h

    qi = pl.program_id(1)
    kv = pl.program_id(2)
    nkv = pl.num_programs(2)

    first_row = qi * tq
    last_row = first_row + tq - 1
    first_col = kv * tkv
    last_col = first_col + tkv - 1

    @pl.when(kv == 0)
    def _init():
        m_sc[...] = jnp.full_like(m_sc, _MASK_VALUE)          # finite, not -inf
        l_sc[...] = jnp.zeros_like(l_sc)
        acc_sc[...] = jnp.zeros_like(acc_sc)

    contract_last = (((1,), (1,)), ((), ()))                  # (m,c)x(n,c) -> (m,n)

    def _attend(masked):
        q = q_ref[...]                                        # (tq, d), compute dtype
        k = k_ref[...]                                        # (tkv, d)
        v = v_ref[...]                                        # (tkv, d)
        if masked:                                            # only on diagonal tiles
            row = first_row + lax.broadcasted_iota(jnp.int32, (tq, tkv), 0)
            col = first_col + lax.broadcasted_iota(jnp.int32, (tq, tkv), 1)
            bias = jnp.where(col > row, _MASK_VALUE, 0.0).astype(jnp.float32)

        m_prev = m_sc[...]                                    # (tq, h)
        l_prev = l_sc[...]                                    # (tq, h)
        acc_prev = acc_sc[...]                                # (tq, d) f32

        m_cols, l_cols, alpha_cols, pv_cols = [], [], [], []
        for hd in range(h):
            sl = slice(hd * dh, (hd + 1) * dh)                # static lane slice (value)
            s = lax.dot_general(q[:, sl], k[:, sl], contract_last,
                                preferred_element_type=jnp.float32)   # (tq, tkv)
            if masked:
                s = s + bias
            m_p = m_prev[:, hd:hd + 1]
            m_n = jnp.maximum(m_p, jnp.max(s, axis=-1, keepdims=True))
            alpha = jnp.exp(m_p - m_n)
            p = jnp.exp(s - m_n)
            l_n = alpha * l_prev[:, hd:hd + 1] + jnp.sum(p, axis=-1, keepdims=True)
            pv = jnp.dot(p.astype(v.dtype), v[:, sl],
                         preferred_element_type=jnp.float32)  # (tq, dh)
            m_cols.append(m_n)
            l_cols.append(l_n)
            alpha_cols.append(jnp.broadcast_to(alpha, (tq, dh)))
            pv_cols.append(pv)

        # Single full-width (lane-dense) store per state per kv step.
        m_sc[...] = jnp.concatenate(m_cols, axis=-1)
        l_sc[...] = jnp.concatenate(l_cols, axis=-1)
        acc_sc[...] = (jnp.concatenate(alpha_cols, axis=-1) * acc_prev
                       + jnp.concatenate(pv_cols, axis=-1))

    needs_compute = first_col <= last_row       # tile not entirely in the causal future
    fully_past = last_col <= first_row          # every (row, col) pair is unmasked

    @pl.when(jnp.logical_and(needs_compute, fully_past))
    def _interior():
        _attend(masked=False)

    @pl.when(jnp.logical_and(needs_compute, jnp.logical_not(fully_past)))
    def _diagonal():
        _attend(masked=True)

    @pl.when(kv == nkv - 1)
    def _finalize():
        # Exact reciprocal (approx EUP rcp caused the previous tolerance failure),
        # broadcast to one full-width multiply, then ONE (tq, d) x (d, d) projection.
        inv = 1.0 / l_sc[...]                                  # (tq, h) f32
        inv_full = jnp.concatenate(
            [jnp.broadcast_to(inv[:, hd:hd + 1], (tq, dh)) for hd in range(h)],
            axis=-1)                                           # (tq, d)
        o = (acc_sc[...] * inv_full).astype(wp_ref.dtype)
        o_ref[...] = jnp.dot(o, wp_ref[...],
                             preferred_element_type=jnp.float32).astype(o_ref.dtype)


# ---------------------------------------------------------------------------
# Wrapper
# ---------------------------------------------------------------------------
def mhsa_pallas(x, wqkv, wproj, *, h, block_q=256, block_kv=256, block_x=256,
                compute_dtype=None):
    B, L, d = x.shape
    assert d % h == 0, "d must be divisible by h"
    dh = d // h
    assert wqkv.shape == (3 * d, d)
    assert wproj.shape == (d, d)

    # bf16 MXU operands (f32 accumulation) when the model runs in f32.
    if compute_dtype is None:
        compute_dtype = jnp.bfloat16 if x.dtype == jnp.float32 else x.dtype
    compute_dtype = jnp.dtype(compute_dtype)
    c_bytes = compute_dtype.itemsize
    x_bytes = jnp.dtype(x.dtype).itemsize

    # Weight glue (one-time, outside the kernels): nn.Linear weights are (out, in);
    # fuse q/k/v, fold the 1/sqrt(dh) scale into W_q, transpose to (in, out).
    scale = 1.0 / math.sqrt(dh)
    w3T = jnp.concatenate([wqkv[:d] * scale, wqkv[d:2 * d], wqkv[2 * d:]],
                          axis=0).T.astype(compute_dtype)     # (d, 3d)
    wpT = wproj.T.astype(compute_dtype)                       # (d, d)

    # 256-wide default tiles fill the v6e/v7x 2x256^2 MXU and cut per-step overhead;
    # pass block_*=128 on v5e (4x128^2 MXU) if desired.
    tl = min(block_x, L)
    tq = min(block_q, L)
    tkv = min(block_kv, L)
    assert L % tl == 0 and L % tq == 0 and L % tkv == 0, "L must divide tile sizes"

    # ---- Kernel 1: fused Q/K/V projection -------------------------------------
    k1_blocks = tl * d * x_bytes + d * 3 * d * c_bytes + 3 * tl * d * c_bytes
    q, k, v = pl.pallas_call(
        _qkv_proj_kernel,
        out_shape=(jax.ShapeDtypeStruct((B, L, d), compute_dtype),) * 3,
        grid_spec=pltpu.PrefetchScalarGridSpec(
            num_scalar_prefetch=0,
            grid=(B, L // tl),
            in_specs=[
                pl.BlockSpec((None, tl, d), lambda b, i: (b, i, 0)),
                pl.BlockSpec((d, 3 * d), lambda b, i: (0, 0)),
            ],
            out_specs=[
                pl.BlockSpec((None, tl, d), lambda b, i: (b, i, 0)),
                pl.BlockSpec((None, tl, d), lambda b, i: (b, i, 0)),
                pl.BlockSpec((None, tl, d), lambda b, i: (b, i, 0)),
            ],
        ),
        compiler_params=pltpu.CompilerParams(
            dimension_semantics=("parallel", "parallel"),
            vmem_limit_bytes=_vmem_limit(k1_blocks)),
    )(x, w3T)

    # ---- Kernel 2: flash attention + output projection -------------------------
    def kv_index_map(b, i, j):
        # Clamp causally-skipped kv tiles to the last tile this q tile needs so the
        # resident K/V block is reused -> no DMA for steps the compute guard skips.
        return (b, jnp.minimum(j, ((i + 1) * tq - 1) // tkv), 0)

    k2_blocks = (tq * d * c_bytes + 2 * tkv * d * c_bytes
                 + d * d * c_bytes + tq * d * x_bytes)
    k2_scratch = tq * d * 4 + 2 * tq * h * 4

    out = pl.pallas_call(
        partial(_flash_attn_kernel, h=h),
        out_shape=jax.ShapeDtypeStruct((B, L, d), x.dtype),
        grid_spec=pltpu.PrefetchScalarGridSpec(
            num_scalar_prefetch=0,
            grid=(B, L // tq, L // tkv),
            in_specs=[
                pl.BlockSpec((None, tq, d), lambda b, i, j: (b, i, 0)),    # Q
                pl.BlockSpec((None, tkv, d), kv_index_map),                # K
                pl.BlockSpec((None, tkv, d), kv_index_map),                # V
                pl.BlockSpec((d, d), lambda b, i, j: (0, 0)),              # W_proj^T
            ],
            out_specs=pl.BlockSpec((None, tq, d), lambda b, i, j: (b, i, 0)),
            scratch_shapes=[
                pltpu.VMEM((tq, d), jnp.float32),   # per-head output accumulator
                pltpu.VMEM((tq, h), jnp.float32),   # running max, all heads
                pltpu.VMEM((tq, h), jnp.float32),   # running sum, all heads
            ],
        ),
        compiler_params=pltpu.CompilerParams(
            dimension_semantics=("parallel", "parallel", "arbitrary"),
            vmem_limit_bytes=_vmem_limit(k2_blocks, k2_scratch)),
    )(q, k, v, wpT)
    return out


# ---------------------------------------------------------------------------
# Pure-JAX reference (replica of MHSA._forward_einsum) for verification
# ---------------------------------------------------------------------------
def mhsa_reference(x, wqkv, wproj, *, h):
    B, L, d = x.shape
    dh = d // h
    qkv = x @ wqkv.T                                          # (B, L, 3d)
    q, k, v = jnp.split(qkv, 3, axis=-1)
    Q = q.reshape(B, L, h, dh)
    K = k.reshape(B, L, h, dh)
    V = v.reshape(B, L, h, dh)
    scores = jnp.einsum("blhd,bmhd->bhlm", Q, K) / math.sqrt(dh)
    mask = jnp.arange(L)[:, None] < jnp.arange(L)[None, :]
    scores = scores + jnp.where(mask, -jnp.inf, 0.0)
    attn = jax.nn.softmax(scores, axis=-1)
    sa = jnp.einsum("bhml,blhd->bmhd", attn, V)               # (B, L, h, dh)
    return sa.reshape(B, L, d) @ wproj.T


if __name__ == "__main__":
    B, L, d, h = 2, 8, 32, 4

    key = jax.random.PRNGKey(0)
    kx, kw1, kw2 = jax.random.split(key, 3)

    x = jax.random.normal(kx, (B, L, d), dtype=jnp.float32)
    # kaiming_normal_(nonlinearity='linear'): std = 1/sqrt(fan_in) = 1/sqrt(d)
    wqkv = jax.random.normal(kw1, (3 * d, d), dtype=jnp.float32) / math.sqrt(d)
    wproj = jax.random.normal(kw2, (d, d), dtype=jnp.float32) / math.sqrt(d)

    ref = mhsa_reference(x, wqkv, wproj, h=h)

    # Parity path: f32 MXU operands.  Tolerance covers TPU default matmul
    # precision and flash-attention re-association vs the direct reference.
    out_f32 = jax.block_until_ready(
        mhsa_pallas(x, wqkv, wproj, h=h, compute_dtype=jnp.float32))
    assert out_f32.shape == (B, L, d)
    err_f32 = float(jnp.max(jnp.abs(out_f32 - ref)))
    assert jnp.allclose(out_f32, ref, atol=2e-2, rtol=2e-2), \
        f"f32-path mismatch vs reference: {err_f32}"

    # Default performance path: bf16 MXU operands + f32 accumulation
    # (standard flash-attention mixed precision; looser tolerance by design).
    out_bf16 = jax.block_until_ready(mhsa_pallas(x, wqkv, wproj, h=h))
    err_bf16 = float(jnp.max(jnp.abs(out_bf16 - ref)))
    assert jnp.allclose(out_bf16, ref, atol=1e-1, rtol=1e-1), \
        f"bf16-path mismatch vs reference: {err_bf16}"

    print("KERNEL_OK")
</pallas_src>

<mosaic_0001>
module attributes {stable_mosaic.version = 11 : i64} {
  func.func @_qkv_proj_kernel(%arg0: i32, %arg1: i32, %arg2: memref<1x8x32xf32, #tpu.memory_space<vmem>>, %arg3: memref<32x96xf32, #tpu.memory_space<vmem>>, %arg4: memref<1x8x32xf32, #tpu.memory_space<vmem>>, %arg5: memref<1x8x32xf32, #tpu.memory_space<vmem>>, %arg6: memref<1x8x32xf32, #tpu.memory_space<vmem>>) attributes {dimension_semantics = [#tpu.dimension_semantics<parallel>, #tpu.dimension_semantics<parallel>], iteration_bounds = array<i64: 2, 1>, scalar_prefetch = 0 : i64, scratch_operands = 0 : i64, tpu.core_type = #tpu.core_type<tc>, window_params = [{transform_indices = @transform_0, window_bounds = array<i64: 1, 8, 32>}, {pipeline_mode = #tpu.pipeline_mode<synchronous>, transform_indices = @transform_1, window_bounds = array<i64: 32, 96>}, {transform_indices = @transform_2, window_bounds = array<i64: 1, 8, 32>}, {transform_indices = @transform_3, window_bounds = array<i64: 1, 8, 32>}, {transform_indices = @transform_4, window_bounds = array<i64: 1, 8, 32>}]} {
    %c0 = arith.constant 0 : index
    %c0_0 = arith.constant 0 : index
    %c0_1 = arith.constant 0 : index
    %0 = vector.load %arg2[%c0, %c0_0, %c0_1] : memref<1x8x32xf32, #tpu.memory_space<vmem>>, vector<1x8x32xf32>
    %1 = vector.shape_cast %0 : vector<1x8x32xf32> to vector<8x32xf32>
    %c0_2 = arith.constant 0 : index
    %c0_3 = arith.constant 0 : index
    %2 = vector.load %arg3[%c0_2, %c0_3] : memref<32x96xf32, #tpu.memory_space<vmem>>, vector<32x96xf32>
    %cst = arith.constant dense<0.000000e+00> : vector<8x96xf32>
    %3 = tpu.matmul %1, %2, %cst {dimension_numbers = #tpu.dot_dimension_numbers<[1], [0], [0], [1], [0, 0, 1, 1], [], []>} : vector<8x32xf32>, vector<32x96xf32>, vector<8x96xf32> -> vector<8x96xf32>
    %4 = vector.extract_strided_slice %3 {offsets = [0, 0], sizes = [8, 32], strides = [1, 1]} : vector<8x96xf32> to vector<8x32xf32>
    %c0_4 = arith.constant 0 : index
    %c0_5 = arith.constant 0 : index
    %c0_6 = arith.constant 0 : index
    %5 = vector.load %arg4[%c0_4, %c0_5, %c0_6] : memref<1x8x32xf32, #tpu.memory_space<vmem>>, vector<1x8x32xf32>
    %6 = vector.shape_cast %5 : vector<1x8x32xf32> to vector<8x32xf32>
    %7 = vector.shape_cast %4 : vector<8x32xf32> to vector<1x8x32xf32>
    tpu.vector_store %arg4[%c0_4, %c0_5, %c0_6], %7 {strides = array<i32>} : memref<1x8x32xf32, #tpu.memory_space<vmem>>, vector<1x8x32xf32>,
    %8 = vector.extract_strided_slice %3 {offsets = [0, 32], sizes = [8, 32], strides = [1, 1]} : vector<8x96xf32> to vector<8x32xf32>
    %c0_7 = arith.constant 0 : index
    %c0_8 = arith.constant 0 : index
    %c0_9 = arith.constant 0 : index
    %9 = vector.load %arg5[%c0_7, %c0_8, %c0_9] : memref<1x8x32xf32, #tpu.memory_space<vmem>>, vector<1x8x32xf32>
    %10 = vector.shape_cast %9 : vector<1x8x32xf32> to vector<8x32xf32>
    %11 = vector.shape_cast %8 : vector<8x32xf32> to vector<1x8x32xf32>
    tpu.vector_store %arg5[%c0_7, %c0_8, %c0_9], %11 {strides = array<i32>} : memref<1x8x32xf32, #tpu.memory_space<vmem>>, vector<1x8x32xf32>,
    %12 = vector.extract_strided_slice %3 {offsets = [0, 64], sizes = [8, 32], strides = [1, 1]} : vector<8x96xf32> to vector<8x32xf32>
    %c0_10 = arith.constant 0 : index
    %c0_11 = arith.constant 0 : index
    %c0_12 = arith.constant 0 : index
    %13 = vector.load %arg6[%c0_10, %c0_11, %c0_12] : memref<1x8x32xf32, #tpu.memory_space<vmem>>, vector<1x8x32xf32>
    %14 = vector.shape_cast %13 : vector<1x8x32xf32> to vector<8x32xf32>
    %15 = vector.shape_cast %12 : vector<8x32xf32> to vector<1x8x32xf32>
    tpu.vector_store %arg6[%c0_10, %c0_11, %c0_12], %15 {strides = array<i32>} : memref<1x8x32xf32, #tpu.memory_space<vmem>>, vector<1x8x32xf32>,
    return
  }
  func.func @transform_0(%arg0: i32, %arg1: i32) -> (i32, i32, i32) {
    %c0_i32 = arith.constant 0 : i32
    %c0_i32_0 = arith.constant 0 : i32
    return %arg0, %arg1, %c0_i32 : i32, i32, i32
  }
  func.func @transform_1(%arg0: i32, %arg1: i32) -> (i32, i32) {
    %c0_i32 = arith.constant 0 : i32
    %c0_i32_0 = arith.constant 0 : i32
    %c0_i32_1 = arith.constant 0 : i32
    return %c0_i32, %c0_i32_0 : i32, i32
  }
  func.func @transform_2(%arg0: i32, %arg1: i32) -> (i32, i32, i32) {
    %c0_i32 = arith.constant 0 : i32
    %c0_i32_0 = arith.constant 0 : i32
    return %arg0, %arg1, %c0_i32 : i32, i32, i32
  }
  func.func @transform_3(%arg0: i32, %arg1: i32) -> (i32, i32, i32) {
    %c0_i32 = arith.constant 0 : i32
    %c0_i32_0 = arith.constant 0 : i32
    return %arg0, %arg1, %c0_i32 : i32, i32, i32
  }
  func.func @transform_4(%arg0: i32, %arg1: i32) -> (i32, i32, i32) {
    %c0_i32 = arith.constant 0 : i32
    %c0_i32_0 = arith.constant 0 : i32
    return %arg0, %arg1, %c0_i32 : i32, i32, i32
  }
}

</mosaic_0001>

<bundles_post_ra>
// kernel: tpu_custom_call.1
= control target key start
LH: loop header
LB: loop body
LE: loop exit
PB: predicated region body
PF: predicated region fallthrough
CT: control target
= control target key end

     0   :  { %10 = vsyncpa [#allocation3], 0  ;;  %s1062_s0 = inlined_call_operand.hbm [shape: f32[2,8,32], index: 0, kind: input, shape index: {}]   ;;  %s1063_s1 = inlined_call_operand.hbm [shape: f32[32,96], index: 1, kind: input, shape index: {}]   ;;  %s1064_s2 = inlined_call_operand.hbm [shape: f32[2,8,32], index: 2, kind: output, shape index: {0}]   ;;  %s1065_s3 = inlined_call_operand.hbm [shape: f32[2,8,32], index: 3, kind: output, shape index: {1}]   ;;  %s1066_s4 = inlined_call_operand.hbm [shape: f32[2,8,32], index: 4, kind: output, shape index: {2}]  }
   0x1   :  { %12 = vsyncpa [#allocation3 + $0x1], 0 }
   0x2   :  { %13 = vsyncpa [#allocation6], 0 }
   0x3   :  { %14 = vsyncpa [#allocation4], 0 }
   0x4   :  { %16 = vsyncpa [#allocation4 + $0x1], 0 }
   0x5   :  { %17 = vsyncpa [#allocation9], 0 }
   0x6   :  { %19 = vsyncpa [#allocation9 + $0x1], 0  ;;  %s869_s15 = smov 0   ;;  %s871_s16 = smov 0  }
   0x7   :  { %s873_s17 = smov 0   ;;  %s875_s18 = smov 0  }
   0x8   :  { %s877_s19 = smov 0   ;;  %s879_s20 = smov 0  }
   0x9 LB: > { %s900_s21 = sadd.s32 4294967295, %s837_s20   ;;  %p524_p0 = scmp.ge.s32.totalorder %s837_s20, 1  ;;  %s837_s20 = sphi %s879_s20, %s25_s20   ;;  %s833_s19 = sphi %s877_s19, %s1078_s19   ;;  %s829_s18 = sphi %s875_s18, %s1077_s18   ;;  %s825_s17 = sphi %s873_s17, %s1076_s17   ;;  %s821_s16 = sphi %s871_s16, %s1075_s16   ;;  %s817_s15 = sphi %s869_s15, %s1074_s15  }
   0xa   : > { %p60_p1 = scmp.eq.s32.totalorder %s900_s21, 0  ;;  %p175_p2 = scmp.lt.s32.totalorder %s837_s20, 3 }
   0xb   : > { %s186_s24 = sshll.u32 %s1063_s1, 4  ;;  %s839_s26 = smov [#allocation5]   ;;  %s187_s24 = int_to_ptr.hbm [resolvable:$true] %s186_s24 }
   0xc   : > { %p908_p3 = pnand %p524_p0, %p175_p2  ;;  %s188_s27 = sshll.u32 %s839_s26, 4  ;;  %s189_s27 = int_to_ptr.vmem [resolvable:$true] %s188_s27 }
   0xd   : > { %p526_p6 = scmp.ge.s32.totalorder %s837_s20, 2  ;;  %s840_s28 = smov 128  }
   0xe   : > { %p556_p4 = pneg %p908_p3  ;;  %s841_s29 = smov 8  }
   0xf   : > { %s1067_s30 = sadd.s32 4294967294, %s837_s20   ;;  %s37_s5 = sadd.s32 1, %s833_s19 }
  0x10   : > { %p557_p5 = pnand %p556_p4, %p60_p1  ;;  %s46_s6 = sadd.s32 1, %s825_s17 }
  0x11   : > { %p39_p7 = scmp.ge.s32.totalorder %s37_s5, 2  ;;  %p53_p8 = scmp.ne.s32.totalorder %s825_s17, %s821_s16 }
  0x12   : > { %559 = dma.hbm_to_vmem [thread:$0]  (!%p557_p5), %s187_s24, 512, %s189_s27, [#allocation6], %s840_s28, %s840_s28, %s841_s29  }
  0x13   : > { %p54_p9 = scmp.eq.s32.totalorder %s837_s20, 0  ;;  %p59_p10 = scmp.ne.s32.totalorder %s821_s16, %s817_s15 }
  0x14   : > { %s1080_s5 = smov (%p39_p7, %s37_s5), 0  ;;  %p106_p13 = scmp.eq.s32.totalorder %s900_s21, 1 }
  0x15   : > { %p927_p11 = por %p54_p9, %p53_p8  ;;  %p933_p12 = por %p60_p1, %p59_p10 }
  0x16   : > { %s41_s9 = ssub.s32 %s833_s19, %s1080_s5  ;;  %p112_p2 = scmp.eq.s32.totalorder %s1067_s30, 1 }
  0x17   : > { %p44_p0 = scmp.eq.s32.totalorder %s41_s9, 0  ;;  %p942_p4 = por %p106_p13, %p53_p8 }
  0x18   : > { %p575_p5 = scmp.lt.s32.totalorder %s837_s20, 2  ;;  %p950_p7 = por %p112_p2, %p59_p10 }
  0x19   : > { %s948_s11 = scalar_select %p44_p0, %s825_s17, %s46_s6  }
  0x1a   : > { %s202_s13 = sand.u32 1, %s825_s17   ;;  %s528_s22 = sshll.u32 %s833_s19, 3 }
  0x1b   : > { %s527_s14 = sshll.u32 %s202_s13, 3  ;;  %s211_s26 = scalar_lea.hbm %s1062_s0, %s528_s22 }
  0x1c   : > { %s206_s27 = scalar_lea.vmem [#allocation2], %s527_s14  ;;  %s213_s29 = sshll.u32 %s211_s26, 4  ;;  %s214_s29 = int_to_ptr.hbm [resolvable:$true] %s213_s29 }
  0x1d   : > { %s215_s28 = sshll.u32 %s206_s27, 4  ;;  %p561_p8 = pnand %p575_p5, %p927_p11  ;;  %s216_s28 = int_to_ptr.vmem [resolvable:$true] %s215_s28 }
  0x1e   : > { %s203_s6 = scalar_lea.sflag [#allocation3], %s202_s13  ;;  %224 = sbr.rel (%p908_p3) target bundleno = 303 (0x12f), region = 28 }
  0x1f   : > { %563 = dma.hbm_to_vmem [thread:$0]  (!%p561_p8), %s214_s29, 128, %s216_s28, %s203_s6  }
  0x20   : > { %s964_s9 = sand.u32 (!%p908_p3), 1, %s821_s16  }
  0x21   : > { %s967_s23 = sshll.u32 (!%p908_p3), %s964_s9, 3  ;;  %s227_s14 = scalar_lea.sflag (!%p908_p3), [#allocation3], %s964_s9 }
  0x22   : > { %s230_s22 = scalar_lea.vmem (!%p908_p3), [#allocation2], %s967_s23 }
  0x23   : > { %800 = dma.done.wait (%p933_p12), %s227_s14, 128  }
  0x24   : > { %802 = vsyncadd (%p933_p12), %s227_s14, 4294967168 }
  0x25   : > { %804 = dma.done.wait (%p60_p1), [#allocation6], 512  }
  0x26   : > { %806 = vsyncadd (%p60_p1), [#allocation6], 4294966784  ;;  %v275_v0 = vld [vmem:[#allocation5 + $0x18] sm:$0xff]  ;;  %v274_v1 = vld [vmem:[#allocation5 + $0x10] sm:$0xff]  ;;  %vm276_vm0 = vcmask 261120   ;;  %s981_s25 = sshll.u32 %s829_s18, 3 }
  0x27   : > { %292 = vmatpush.msra.mxu0 %v275_v0  ;;  %v273_v2 = vld [vmem:[#allocation5 + $0x8] sm:$0xff]  ;;  %v272_v3 = vld [vmem:[#allocation5] sm:$0xff]  ;;  %v271_v4 = vld [vmem:[%s230_s22] sm:$0xff]  ;;  %s332_s13 = scalar_lea.hbm %s1064_s2, %s981_s25  ;;  %s256_s24 = scalar_lea.vmem [#allocation7], %s967_s23 }
  0x28   : > { %s334_s26 = sshll.u32 %s256_s24, 4  ;;  %s336_s27 = sshll.u32 %s332_s13, 4  ;;  %s335_s26 = int_to_ptr.vmem [resolvable:$true] %s334_s26  ;;  %s337_s27 = int_to_ptr.hbm [resolvable:$true] %s336_s27 }
  0x29   : > { %293 = vmatpush.msra.mxu0 %v274_v1  ;;  %s842_s28 = smov 96   ;;  %s311_s29 = scalar_lea.sflag [#allocation4], %s964_s9 }
  0x2a   : > { %s705_s6 = sshra.s32 %s337_s27, 4  ;;  %s711_s7 = scalar_lea.hbm %s1064_s2, 16  ;;  %s706_s6 = int_to_ptr.hbm [resolvable:$true] %s705_s6 }
  0x2b   : > { %294 = vmatpush.msra.mxu0 %v273_v2  ;;  %s707_s18 = scalar_lea.hbm %s706_s6, 8  ;;  %p712_p10 = scmp.lt.s32.totalorder %s706_s6, %s1064_s2 }
  0x2c   : > { %p708_p1 = scmp.ne.s32.totalorder %s706_s6, %s707_s18  ;;  %p713_p11 = scmp.lt.s32.totalorder %s711_s7, %s707_s18 }
  0x2d   : > { %295 = vmatpush.msra.mxu0 %v272_v3 }
  0x2e   : > { %535 = vmatmul.msk.f32.vlgmr.msra.gmra.mxu0 %vm276_vm0, %v271_v4  ;;  %p709_p3 = pnand %p708_p1, %p942_p4  ;;  %p714_p12 = por %p713_p11, %p712_p10 }
  0x30   : > { %p710_p9 = pneg %p709_p3 }
  0x32   : > { %p715_p13 = pnand %p714_p12, %p710_p9 }
  0xab   : > { %v297_v5 = vpop.f32.mrf.mxu0 }
  0xac   : > { %300 = vst.msk [vmem:[%s256_s24] sm:$0xff] %vm276_vm0, %v297_v5  ;;  %302 = vrot.lane.b32.xlu0 %v297_v5, %s842_s28 }
  0xad   : > { %718 = shalt.err (!%p715_p13)
}
  0xae   : > { %550 = dma.vmem_to_hbm [thread:$0]  (%p942_p4), %s335_s26, 128, %s337_s27, %s311_s29  }
  0xaf   : > { %s843_s9 = smov 64   ;;  %s347_s14 = scalar_lea.hbm %s1065_s3, %s981_s25 }
  0xb0   : > { %s315_s22 = sand.u32 1, %s900_s21   ;;  %s263_s6 = scalar_lea.vmem [#allocation8], %s967_s23 }
  0xb1   : > { %s349_s18 = sshll.u32 %s263_s6, 4  ;;  %s351_s7 = sshll.u32 %s347_s14, 4  ;;  %s350_s18 = int_to_ptr.vmem [resolvable:$true] %s349_s18  ;;  %s352_s7 = int_to_ptr.hbm [resolvable:$true] %s351_s7 }
  0xb2   : > { %s362_s26 = scalar_lea.hbm %s1066_s4, %s981_s25  ;;  %s1011_s27 = scalar_lea.sflag [#allocation9], %s315_s22 }
  0xb3   : > { %s733_s29 = sshra.s32 %s352_s7, 4  ;;  %s739_s28 = scalar_lea.hbm %s1065_s3, 16  ;;  %s734_s29 = int_to_ptr.hbm [resolvable:$true] %s733_s29 }
  0xb4   : > { %306 = vrot.lane.b32.xlu0 %v297_v5, %s843_s9  ;;  %s735_s9 = scalar_lea.hbm %s734_s29, 8  ;;  %p740_p8 = scmp.lt.s32.totalorder %s734_s29, %s1065_s3 }
  0xb5   : > { %p736_p0 = scmp.ne.s32.totalorder %s734_s29, %s735_s9  ;;  %p741_p1 = scmp.lt.s32.totalorder %s739_s28, %s735_s9 }
  0xb7   : > { %p737_p2 = pnand %p736_p0, %p942_p4  ;;  %p742_p3 = por %p741_p1, %p740_p8 }
  0xb9   : > { %p738_p5 = pneg %p737_p2 }
  0xbb   : > { %p743_p9 = pnand %p742_p3, %p738_p5 }
 0x11e   : > { %v303_v6 = vpop.permute.xlu0 %302 }
 0x11f   : > { %305 = vst.msk [vmem:[%s263_s6] sm:$0xff] %vm276_vm0, %v303_v6 }
 0x120   : > { %746 = shalt.err (!%p743_p9)
}
 0x121   : > { %551 = dma.vmem_to_hbm [thread:$0]  (%p942_p4), %s350_s18, 128, %s352_s7, %s1011_s27  }
 0x122   : > { %s270_s25 = scalar_lea.vmem [#allocation10], %s967_s23  ;;  %s366_s6 = sshll.u32 %s362_s26, 4  ;;  %s367_s6 = int_to_ptr.hbm [resolvable:$true] %s366_s6 }
 0x123   : > { %s364_s22 = sshll.u32 %s270_s25, 4  ;;  %s761_s30 = sshra.s32 %s367_s6, 4  ;;  %s365_s22 = int_to_ptr.vmem [resolvable:$true] %s364_s22  ;;  %s762_s30 = int_to_ptr.hbm [resolvable:$true] %s761_s30 }
 0x124   : > { %s763_s8 = scalar_lea.hbm %s762_s30, 8  ;;  %s767_s9 = scalar_lea.hbm %s1066_s4, 16 }
 0x125   : > { %p764_p10 = scmp.ne.s32.totalorder %s762_s30, %s763_s8  ;;  %p768_p13 = scmp.lt.s32.totalorder %s762_s30, %s1066_s4 }
 0x126   : > { %v307_v7 = vpop.permute.xlu0 %306  ;;  %p769_p0 = scmp.lt.s32.totalorder %s767_s9, %s763_s8 }
 0x127   : > { %309 = vst.msk [vmem:[%s270_s25] sm:$0xff] %vm276_vm0, %v307_v7  ;;  %p765_p11 = pnand %p764_p10, %p942_p4 }
 0x128   : > { %p770_p2 = por %p769_p0, %p768_p13 }
 0x129   : > { %p766_p12 = pneg %p765_p11 }
 0x12b   : > { %p771_p5 = pnand %p770_p2, %p766_p12 }
 0x12d   : > { %774 = shalt.err (!%p771_p5)
}
 0x12e   : > { %552 = dma.vmem_to_hbm [thread:$0]  (%p942_p4), %s365_s22, 128, %s367_s6, %s1011_s27  }
 0x12f PF: > { %s378_s7 = sand.u32 1, %s817_s15   ;;  %p565_p8 = pnand %p526_p6, %p950_p7 }
 0x130   : > { %s379_s26 = scalar_lea.sflag [#allocation4], %s378_s7 }
 0x131   : > { %p566_p1 = pneg %p565_p8 }
 0x133   : > { %808 = dma.done.wait (%p566_p1), %s379_s26, 128  }
 0x134   : > { %810 = vsyncadd (%p566_p1), %s379_s26, 4294967168  ;;  %s1073_s21 = sadd.s32 4294967294, %s837_s20  }
 0x135   : > { %s388_s24 = sand.u32 1, %s1073_s21  }
 0x136   : > { %s389_s28 = scalar_lea.sflag [#allocation9], %s388_s24 }
 0x137   : > { %812 = dma.done.wait (%p566_p1), %s389_s28, 256  }
 0x138   : > { %814 = vsyncadd (%p566_p1), %s389_s28, 4294967040  ;;  %s25_s20 = sadd.s32 1, %s837_s20   ;;  %s1074_s15 = smov %s821_s16 }
 0x139   : > { %p22_p4 = scmp.ge.s32.totalorder %s25_s20, 4   ;;  %s1075_s16 = smov %s825_s17 }
 0x13a   : > { %s1076_s17 = smov %s948_s11  ;;  %s1077_s18 = smov %s833_s19 }
 0x13b   : > { %s1078_s19 = smov %s1080_s5  ;;  %24 = sbr.rel (!%p22_p4) target bundleno = 9 (0x9), region = 109 }
 0x140   :  { %405 = vsyncpa [#allocation3], 1 }
 0x141   :  { %407 = vsyncpa [#allocation3 + $0x1], 1 }
 0x142   :  { %408 = vsyncpa [#allocation6], 1 }
 0x143   :  { %409 = vsyncpa [#allocation4], 1 }
 0x144   :  { %411 = vsyncpa [#allocation4 + $0x1], 1 }
 0x145   :  { %412 = vsyncpa [#allocation9], 1 }
 0x146   :  { %414 = vsyncpa [#allocation9 + $0x1], 1 }

</bundles_post_ra>
